<compile_context>
chip_gen: v6e
topology: v6e:2x2x1
jax: 0.10.0
libtpu: 0.0.40
codegen_flags: <defaults>
</compile_context>

<pallas_src>
import jax
import jax.numpy as jnp
from jax import lax
from jax.experimental import pallas as pl
from jax.experimental.pallas import tpu as pltpu


def _round_up(x: int, m: int) -> int:
    return ((x + m - 1) // m) * m


def _pad2(a, rows: int, cols: int):
    return jnp.pad(a, ((0, rows - a.shape[0]), (0, cols - a.shape[1])))


# ---------------------------------------------------------------------------
# Kernels
# ---------------------------------------------------------------------------

def _noisy_linear_kernel(x_ref, wmu_ref, wsig_ref, epsi_ref, epsj_ref,
                         bias_ref, o_ref, acc_ref):
    """One (tm, tn) output tile, accumulating over the k (in_dim) grid axis."""
    k = pl.program_id(2)

    @pl.when(k == 0)
    def _():
        acc_ref[...] = jnp.zeros_like(acc_ref)

    # Rank-1 factorized noise tile built in-register (never read from HBM).
    w = wmu_ref[...] + wsig_ref[...] * (epsj_ref[...] * epsi_ref[...])
    # x (tm, tk) contracted with w (tn, tk) along dim 1  ==  x @ w.T,
    # with the transpose folded into the MXU operand feed (no XLU pass).
    acc_ref[...] += lax.dot_general(
        x_ref[...], w,
        dimension_numbers=(((1,), (1,)), ((), ())),
        preferred_element_type=jnp.float32)

    @pl.when(k == pl.num_programs(2) - 1)
    def _():
        o_ref[...] = (acc_ref[...] + bias_ref[...]).astype(o_ref.dtype)


def _plain_linear_kernel(x_ref, wmu_ref, bias_ref, o_ref, acc_ref):
    """Eval path: y = x @ w_mu.T + b_mu, no noise operands at all."""
    k = pl.program_id(2)

    @pl.when(k == 0)
    def _():
        acc_ref[...] = jnp.zeros_like(acc_ref)

    acc_ref[...] += lax.dot_general(
        x_ref[...], wmu_ref[...],
        dimension_numbers=(((1,), (1,)), ((), ())),
        preferred_element_type=jnp.float32)

    @pl.when(k == pl.num_programs(2) - 1)
    def _():
        o_ref[...] = (acc_ref[...] + bias_ref[...]).astype(o_ref.dtype)


# ---------------------------------------------------------------------------
# Wrappers
# ---------------------------------------------------------------------------

_TM_CAP, _TN_CAP, _TK_CAP = 128, 256, 512   # sized for v7x's 64 MiB VMEM


def _tiling(B: int, K: int, N: int):
    Bp = _round_up(B, 8)
    Kp = _round_up(K, 128)
    Np = _round_up(N, 128)
    tm = min(_TM_CAP, Bp)
    tn = min(_TN_CAP, Np)
    tk = min(_TK_CAP, Kp)
    Bp = _round_up(Bp, tm)
    Kp = _round_up(Kp, tk)
    Np = _round_up(Np, tn)
    return Bp, Kp, Np, tm, tn, tk


_COMPILER_PARAMS = pltpu.CompilerParams(
    dimension_semantics=("parallel", "parallel", "arbitrary"))


@jax.jit
def noisy_linear_pallas(x, w_mu, w_sigma, eps_i, eps_j, b_mu, b_sigma):
    """Training forward: x @ (w_mu + w_sigma * outer(eps_j, eps_i)).T + bias."""
    B, K = x.shape
    N = w_mu.shape[0]
    Bp, Kp, Np, tm, tn, tk = _tiling(B, K, N)

    bias = (b_mu + b_sigma * eps_j).reshape(1, N)   # O(N) rank-1 bias in JAX

    xp = _pad2(x, Bp, Kp)
    wmup = _pad2(w_mu, Np, Kp)
    wsigp = _pad2(w_sigma, Np, Kp)
    epsip = _pad2(eps_i.reshape(1, K), 1, Kp)       # (1, Kp) lane row
    epsjp = _pad2(eps_j.reshape(N, 1), Np, 1)       # (Np, 1) sublane column
    biasp = _pad2(bias, 1, Np)

    grid = (Bp // tm, Np // tn, Kp // tk)
    cost = pl.CostEstimate(
        flops=2 * Bp * Np * Kp + 2 * Np * Kp,
        transcendentals=0,
        bytes_accessed=4 * (Bp * Kp + 2 * Np * Kp + Bp * Np + Np + Kp))

    out = pl.pallas_call(
        _noisy_linear_kernel,
        out_shape=jax.ShapeDtypeStruct((Bp, Np), x.dtype),
        grid_spec=pltpu.PrefetchScalarGridSpec(
            num_scalar_prefetch=0,
            grid=grid,
            in_specs=[
                pl.BlockSpec((tm, tk), lambda i, j, k: (i, k)),   # x
                pl.BlockSpec((tn, tk), lambda i, j, k: (j, k)),   # w_mu
                pl.BlockSpec((tn, tk), lambda i, j, k: (j, k)),   # w_sigma
                pl.BlockSpec((1, tk), lambda i, j, k: (0, k)),    # eps_i row
                pl.BlockSpec((tn, 1), lambda i, j, k: (j, 0)),    # eps_j col
                pl.BlockSpec((1, tn), lambda i, j, k: (0, j)),    # bias row
            ],
            out_specs=pl.BlockSpec((tm, tn), lambda i, j, k: (i, j)),
            scratch_shapes=[pltpu.VMEM((tm, tn), jnp.float32)],
        ),
        compiler_params=_COMPILER_PARAMS,
        cost_estimate=cost,
    )(xp, wmup, wsigp, epsip, epsjp, biasp)
    return out[:B, :N]


@jax.jit
def plain_linear_pallas(x, w_mu, b_mu):
    """Eval forward: x @ w_mu.T + b_mu (streams only w_mu and b_mu)."""
    B, K = x.shape
    N = w_mu.shape[0]
    Bp, Kp, Np, tm, tn, tk = _tiling(B, K, N)

    xp = _pad2(x, Bp, Kp)
    wmup = _pad2(w_mu, Np, Kp)
    biasp = _pad2(b_mu.reshape(1, N), 1, Np)

    grid = (Bp // tm, Np // tn, Kp // tk)
    cost = pl.CostEstimate(
        flops=2 * Bp * Np * Kp,
        transcendentals=0,
        bytes_accessed=4 * (Bp * Kp + Np * Kp + Bp * Np + Np))

    out = pl.pallas_call(
        _plain_linear_kernel,
        out_shape=jax.ShapeDtypeStruct((Bp, Np), x.dtype),
        grid_spec=pltpu.PrefetchScalarGridSpec(
            num_scalar_prefetch=0,
            grid=grid,
            in_specs=[
                pl.BlockSpec((tm, tk), lambda i, j, k: (i, k)),   # x
                pl.BlockSpec((tn, tk), lambda i, j, k: (j, k)),   # w_mu
                pl.BlockSpec((1, tn), lambda i, j, k: (0, j)),    # bias row
            ],
            out_specs=pl.BlockSpec((tm, tn), lambda i, j, k: (i, j)),
            scratch_shapes=[pltpu.VMEM((tm, tn), jnp.float32)],
        ),
        compiler_params=_COMPILER_PARAMS,
        cost_estimate=cost,
    )(xp, wmup, biasp)
    return out[:B, :N]


# ---------------------------------------------------------------------------
# Parameter setup + factorized noise generation (plain JAX glue)
# ---------------------------------------------------------------------------

def init_params(key, in_dim, out_dim, sigma_init=0.4):
    """Mirrors NoisyLinearNet.set_parameters()."""
    k1, k2 = jax.random.split(key)
    mu_range = jnp.sqrt(3.0 / in_dim)
    w_mu = jax.random.uniform(k1, (out_dim, in_dim), jnp.float32,
                              minval=-mu_range, maxval=mu_range)
    b_mu = jax.random.uniform(k2, (out_dim,), jnp.float32,
                              minval=-mu_range, maxval=mu_range)
    w_sigma = jnp.full((out_dim, in_dim), sigma_init / jnp.sqrt(in_dim),
                       dtype=jnp.float32)
    b_sigma = jnp.full((out_dim,), sigma_init / jnp.sqrt(out_dim),
                       dtype=jnp.float32)
    return w_mu, w_sigma, b_mu, b_sigma


def _noise_func(key, size):
    """x.sign() * sqrt(|x|) for x ~ N(0,1)  (factorized-noise transform)."""
    x = jax.random.normal(key, (size,), jnp.float32)
    return jnp.sign(x) * jnp.sqrt(jnp.abs(x))


def reset_noise(key, in_dim, out_dim):
    """Mirrors NoisyLinearNet.reset_noise(), but returns the rank-1 factors
    (eps_i, eps_j) instead of the materialized outer-product matrix."""
    ki, kj = jax.random.split(key)
    eps_i = _noise_func(ki, in_dim)
    eps_j = _noise_func(kj, out_dim)
    return eps_i, eps_j


def noisy_linear_forward(x, params, noise_key=None, training=True):
    w_mu, w_sigma, b_mu, b_sigma = params
    out_dim, in_dim = w_mu.shape
    if training:
        eps_i, eps_j = reset_noise(noise_key, in_dim, out_dim)
        return noisy_linear_pallas(x, w_mu, w_sigma, eps_i, eps_j,
                                   b_mu, b_sigma)
    # eval: plain linear with mu parameters only (no zero-noise fabrication)
    return plain_linear_pallas(x, w_mu, b_mu)


if __name__ == "__main__":
    key = jax.random.PRNGKey(0)
    k_param, k_x, k_noise = jax.random.split(key, 3)

    in_dim, out_dim, batch = 32, 32, 8
    params = init_params(k_param, in_dim, out_dim, sigma_init=0.4)
    x = jax.random.normal(k_x, (batch, in_dim), jnp.float32)

    # training-mode forward (factorized noise applied)
    out_train = noisy_linear_forward(x, params, noise_key=k_noise,
                                     training=True)
    out_train = jax.block_until_ready(out_train)

    # eval-mode forward (plain linear with mu parameters)
    out_eval = noisy_linear_forward(x, params, training=False)
    out_eval = jax.block_until_ready(out_eval)

    # reference check in plain JAX (same math as the PyTorch module)
    w_mu, w_sigma, b_mu, b_sigma = params
    eps_i, eps_j = reset_noise(k_noise, in_dim, out_dim)
    w_noise = jnp.outer(eps_j, eps_i)          # torch.ger(epsilon_j, epsilon_i)
    ref_train = x @ (w_mu + w_sigma * w_noise).T + (b_mu + b_sigma * eps_j)
    ref_eval = x @ w_mu.T + b_mu
    assert out_train.shape == (batch, out_dim)
    assert out_eval.shape == (batch, out_dim)
    assert jnp.allclose(out_train, ref_train, atol=1e-4, rtol=1e-4)
    assert jnp.allclose(out_eval, ref_eval, atol=1e-4, rtol=1e-4)

    print("KERNEL_OK")
</pallas_src>

<mosaic_0001>
module attributes {stable_mosaic.version = 11 : i64} {
  func.func @_noisy_linear_kernel(%arg0: i32, %arg1: i32, %arg2: i32, %arg3: memref<8x128xf32, #tpu.memory_space<vmem>>, %arg4: memref<128x128xf32, #tpu.memory_space<vmem>>, %arg5: memref<128x128xf32, #tpu.memory_space<vmem>>, %arg6: memref<1x128xf32, #tpu.memory_space<vmem>>, %arg7: memref<128x1xf32, #tpu.memory_space<vmem>>, %arg8: memref<1x128xf32, #tpu.memory_space<vmem>>, %arg9: memref<8x128xf32, #tpu.memory_space<vmem>>, %arg10: memref<8x128xf32, #tpu.memory_space<vmem>>) attributes {dimension_semantics = [#tpu.dimension_semantics<parallel>, #tpu.dimension_semantics<parallel>, #tpu.dimension_semantics<arbitrary>], iteration_bounds = array<i64: 1, 1, 1>, scalar_prefetch = 0 : i64, scratch_operands = 1 : i64, tpu.core_type = #tpu.core_type<tc>, window_params = [{transform_indices = @transform_0, window_bounds = array<i64: 8, 128>}, {transform_indices = @transform_1, window_bounds = array<i64: 128, 128>}, {transform_indices = @transform_2, window_bounds = array<i64: 128, 128>}, {transform_indices = @transform_3, window_bounds = array<i64: 1, 128>}, {transform_indices = @transform_4, window_bounds = array<i64: 128, 1>}, {transform_indices = @transform_5, window_bounds = array<i64: 1, 128>}, {transform_indices = @transform_6, window_bounds = array<i64: 8, 128>}]} {
    %c0_i32 = arith.constant 0 : i32
    %0 = arith.cmpi eq, %arg2, %c0_i32 : i32
    %1 = arith.extui %0 : i1 to i32
    %c0_i32_0 = arith.constant 0 : i32
    %2 = arith.cmpi ne, %1, %c0_i32_0 : i32
    scf.if %2 {
      %cst_16 = arith.constant 0.000000e+00 : f32
      %20 = vector.broadcast %cst_16 : f32 to vector<8x128xf32>
      %c0_17 = arith.constant 0 : index
      %c0_18 = arith.constant 0 : index
      %21 = vector.load %arg10[%c0_17, %c0_18] : memref<8x128xf32, #tpu.memory_space<vmem>>, vector<8x128xf32>
      tpu.vector_store %arg10[%c0_17, %c0_18], %20 {strides = array<i32>} : memref<8x128xf32, #tpu.memory_space<vmem>>, vector<8x128xf32>,
    } else {
    }
    %c0 = arith.constant 0 : index
    %c0_1 = arith.constant 0 : index
    %3 = vector.load %arg4[%c0, %c0_1] : memref<128x128xf32, #tpu.memory_space<vmem>>, vector<128x128xf32>
    %c0_2 = arith.constant 0 : index
    %c0_3 = arith.constant 0 : index
    %4 = vector.load %arg5[%c0_2, %c0_3] : memref<128x128xf32, #tpu.memory_space<vmem>>, vector<128x128xf32>
    %c0_4 = arith.constant 0 : index
    %c0_5 = arith.constant 0 : index
    %5 = vector.load %arg7[%c0_4, %c0_5] : memref<128x1xf32, #tpu.memory_space<vmem>>, vector<128x1xf32>
    %c0_6 = arith.constant 0 : index
    %c0_7 = arith.constant 0 : index
    %6 = vector.load %arg6[%c0_6, %c0_7] : memref<1x128xf32, #tpu.memory_space<vmem>>, vector<1x128xf32>
    %7 = vector.broadcast %5 : vector<128x1xf32> to vector<128x128xf32>
    %8 = vector.broadcast %6 : vector<1x128xf32> to vector<128x128xf32>
    %9 = arith.mulf %7, %8 : vector<128x128xf32>
    %10 = arith.mulf %4, %9 : vector<128x128xf32>
    %11 = arith.addf %3, %10 : vector<128x128xf32>
    %c0_8 = arith.constant 0 : index
    %c0_9 = arith.constant 0 : index
    %12 = vector.load %arg10[%c0_8, %c0_9] : memref<8x128xf32, #tpu.memory_space<vmem>>, vector<8x128xf32>
    %c0_10 = arith.constant 0 : index
    %c0_11 = arith.constant 0 : index
    %13 = vector.load %arg3[%c0_10, %c0_11] : memref<8x128xf32, #tpu.memory_space<vmem>>, vector<8x128xf32>
    %cst = arith.constant dense<0.000000e+00> : vector<8x128xf32>
    %14 = tpu.matmul %13, %11, %cst {dimension_numbers = #tpu.dot_dimension_numbers<[1], [1], [0], [0], [0, 0, 1, 0], [], []>} : vector<8x128xf32>, vector<128x128xf32>, vector<8x128xf32> -> vector<8x128xf32>
    %15 = arith.addf %12, %14 : vector<8x128xf32>
    %c0_12 = arith.constant 0 : index
    %c0_13 = arith.constant 0 : index
    %16 = vector.load %arg10[%c0_12, %c0_13] : memref<8x128xf32, #tpu.memory_space<vmem>>, vector<8x128xf32>
    tpu.vector_store %arg10[%c0_12, %c0_13], %15 {strides = array<i32>} : memref<8x128xf32, #tpu.memory_space<vmem>>, vector<8x128xf32>,
    %c0_i32_14 = arith.constant 0 : i32
    %17 = arith.cmpi eq, %arg2, %c0_i32_14 : i32
    %18 = arith.extui %17 : i1 to i32
    %c0_i32_15 = arith.constant 0 : i32
    %19 = arith.cmpi ne, %18, %c0_i32_15 : i32
    scf.if %19 {
      %c0_16 = arith.constant 0 : index
      %c0_17 = arith.constant 0 : index
      %20 = vector.load %arg10[%c0_16, %c0_17] : memref<8x128xf32, #tpu.memory_space<vmem>>, vector<8x128xf32>
      %c0_18 = arith.constant 0 : index
      %c0_19 = arith.constant 0 : index
      %21 = vector.load %arg8[%c0_18, %c0_19] : memref<1x128xf32, #tpu.memory_space<vmem>>, vector<1x128xf32>
      %22 = vector.broadcast %21 : vector<1x128xf32> to vector<8x128xf32>
      %23 = arith.addf %20, %22 : vector<8x128xf32>
      %c0_20 = arith.constant 0 : index
      %c0_21 = arith.constant 0 : index
      %24 = vector.load %arg9[%c0_20, %c0_21] : memref<8x128xf32, #tpu.memory_space<vmem>>, vector<8x128xf32>
      tpu.vector_store %arg9[%c0_20, %c0_21], %23 {strides = array<i32>} : memref<8x128xf32, #tpu.memory_space<vmem>>, vector<8x128xf32>,
    } else {
    }
    return
  }
  func.func @transform_0(%arg0: i32, %arg1: i32, %arg2: i32) -> (i32, i32) {
    %c0_i32 = arith.constant 0 : i32
    return %arg0, %arg2 : i32, i32
  }
  func.func @transform_1(%arg0: i32, %arg1: i32, %arg2: i32) -> (i32, i32) {
    %c0_i32 = arith.constant 0 : i32
    return %arg1, %arg2 : i32, i32
  }
  func.func @transform_2(%arg0: i32, %arg1: i32, %arg2: i32) -> (i32, i32) {
    %c0_i32 = arith.constant 0 : i32
    return %arg1, %arg2 : i32, i32
  }
  func.func @transform_3(%arg0: i32, %arg1: i32, %arg2: i32) -> (i32, i32) {
    %c0_i32 = arith.constant 0 : i32
    %c0_i32_0 = arith.constant 0 : i32
    return %c0_i32, %arg2 : i32, i32
  }
  func.func @transform_4(%arg0: i32, %arg1: i32, %arg2: i32) -> (i32, i32) {
    %c0_i32 = arith.constant 0 : i32
    %c0_i32_0 = arith.constant 0 : i32
    return %arg1, %c0_i32 : i32, i32
  }
  func.func @transform_5(%arg0: i32, %arg1: i32, %arg2: i32) -> (i32, i32) {
    %c0_i32 = arith.constant 0 : i32
    %c0_i32_0 = arith.constant 0 : i32
    return %c0_i32, %arg1 : i32, i32
  }
  func.func @transform_6(%arg0: i32, %arg1: i32, %arg2: i32) -> (i32, i32) {
    %c0_i32 = arith.constant 0 : i32
    return %arg0, %arg1 : i32, i32
  }
}

</mosaic_0001>

<bundles_post_ra>
// kernel: noisy_linear_pallas.1
= control target key start
LH: loop header
LB: loop body
LE: loop exit
PB: predicated region body
PF: predicated region fallthrough
CT: control target
= control target key end

     0   :  { %v395_v2 = vmov 0   ;;  %v396_v5 = vmov 0.0   ;;  %s625_s0 = inlined_call_operand.vmem [shape: f32[8,128], index: 0, kind: input, shape index: {}]   ;;  %s626_s1 = inlined_call_operand.vmem [shape: f32[128,128], index: 1, kind: input, shape index: {}]   ;;  %s627_s2 = inlined_call_operand.vmem [shape: f32[128,128], index: 2, kind: input, shape index: {}]   ;;  %s628_s3 = inlined_call_operand.vmem [shape: f32[1,128], index: 3, kind: input, shape index: {}]   ;;  %s629_s4 = inlined_call_operand.vmem [shape: f32[128,1], index: 4, kind: input, shape index: {}]   ;;  %s630_s5 = inlined_call_operand.vmem [shape: f32[1,128], index: 5, kind: input, shape index: {}]   ;;  %s631_s6 = inlined_call_operand.hbm [shape: f32[8,128], index: 6, kind: output, shape index: {}]  }
   0x1   :  { %v76_v0 = vld [vmem:[%s629_s4 + $0x78] sm:$0xff]  ;;  %v74_v1 = vld [vmem:[%s629_s4 + $0x68] sm:$0xff]  ;;  %372 = vset.pattern.permute.xlu1 %v395_v2  ;;  %371 = vset.pattern.permute.xlu0 %v395_v2  ;;  %v75_v3 = vld [vmem:[%s629_s4 + $0x70] sm:$0xff] }
   0x2   :  { %155 = vperm.xlu0 %371, %v76_v0   ;;  %145 = vperm.xlu1 %372, %v74_v1   ;;  %v73_v4 = vld [vmem:[%s629_s4 + $0x60] sm:$0xff]  ;;  %v72_v6 = vld [vmem:[%s629_s4 + $0x58] sm:$0xff]  ;;  %v71_v7 = vld [vmem:[%s629_s4 + $0x50] sm:$0xff] }
   0x3   :  { %332 = vmatprep.subr.mxu0 %v396_v5 }
   0x6   :  { %150 = vperm.xlu0 %371, %v75_v3   ;;  %140 = vperm.xlu1 %372, %v73_v4  }
   0x7   :  { %11 = vsyncpa [#allocation4], 0  ;;  %v70_v8 = vld [vmem:[%s629_s4 + $0x48] sm:$0xff]  ;;  %v69_v9 = vld [vmem:[%s629_s4 + $0x40] sm:$0xff]  ;;  %vm397_vm0 = vmmov 0   ;;  %s398_s20 = smov [#allocation3]  }
   0x8   :  { %v68_v10 = vld [vmem:[%s629_s4 + $0x38] sm:$0xff]  ;;  %v67_v11 = vld [vmem:[%s629_s4 + $0x30] sm:$0xff]  ;;  %v66_v12 = vld [vmem:[%s629_s4 + $0x28] sm:$0xff]  ;;  %364 = vmatprep.mubr.msk.f32.mxu0 %vm397_vm0, %v396_v5  ;;  %s305_s21 = sshll.u32 %s398_s20, 4  ;;  %s306_s21 = int_to_ptr.vmem [resolvable:$true] %s305_s21 }
   0x9   :  { %v65_v13 = vld [vmem:[%s629_s4 + $0x20] sm:$0xff]  ;;  %v64_v14 = vld [vmem:[%s629_s4 + $0x18] sm:$0xff]  ;;  %v63_v15 = vld [vmem:[%s629_s4 + $0x10] sm:$0xff]  ;;  %p378_p1 = scmp.lt.s32.totalorder %s306_s21, %s306_s21 }
   0xa   :  { %135 = vperm.xlu0 %371, %v72_v6   ;;  %130 = vperm.xlu1 %372, %v71_v7   ;;  %v62_v16 = vld [vmem:[%s629_s4 + $0x8] sm:$0xff]  ;;  %v61_v17 = vld [vmem:[%s629_s4] sm:$0xff]  ;;  %v60_v20 = vld [vmem:[%s627_s2 + $0x78] sm:$0xff] }
   0xb   :  { %v487_v18 = vld [vmem:[%s628_s3] ss:$0 sm:$0xff]  ;;  %v44_v23 = vld [vmem:[%s626_s1 + $0x78] sm:$0xff]  ;;  %v58_v26 = vld [vmem:[%s627_s2 + $0x68] sm:$0xff] }
   0xc   :  { %v59_v28 = vld [vmem:[%s627_s2 + $0x70] sm:$0xff]  ;;  %v42_v35 = vld [vmem:[%s626_s1 + $0x68] sm:$0xff]  ;;  %v57_v38 = vld [vmem:[%s627_s2 + $0x60] sm:$0xff] }
   0xd   :  { %v43_v31 = vld [vmem:[%s626_s1 + $0x70] sm:$0xff]  ;;  %v56_v43 = vld [vmem:[%s627_s2 + $0x58] sm:$0xff]  ;;  %v41_v45 = vld [vmem:[%s626_s1 + $0x60] sm:$0xff] }
   0xe   :  { %125 = vperm.xlu0 %371, %v70_v8   ;;  %120 = vperm.xlu1 %372, %v69_v9   ;;  %v55_v49 = vld [vmem:[%s627_s2 + $0x50] sm:$0xff]  ;;  %v40_v51 = vld [vmem:[%s626_s1 + $0x58] sm:$0xff]  ;;  %v54_v55 = vld [vmem:[%s627_s2 + $0x48] sm:$0xff] }
   0xf   :  { %v39_v57 = vld [vmem:[%s626_s1 + $0x50] sm:$0xff]  ;;  %v53_v61 = vld [vmem:[%s627_s2 + $0x40] sm:$0xff]  ;;  %v38_v63 = vld [vmem:[%s626_s1 + $0x48] sm:$0xff] }
  0x10   :  { %v52_v3 = vld [vmem:[%s627_s2 + $0x38] sm:$0xff]  ;;  %v37_v6 = vld [vmem:[%s626_s1 + $0x40] sm:$0xff] }
  0x12   :  { %115 = vperm.xlu0 %371, %v68_v10   ;;  %110 = vperm.xlu1 %372, %v67_v11   ;;  %v51_v10 = vld [vmem:[%s627_s2 + $0x30] sm:$0xff] }
  0x16   :  { %105 = vperm.xlu0 %371, %v66_v12   ;;  %100 = vperm.xlu1 %372, %v65_v13   ;;  %v36_v12 = vld [vmem:[%s626_s1 + $0x38] sm:$0xff] }
  0x1a   :  { %95 = vperm.xlu0 %371, %v64_v14   ;;  %90 = vperm.xlu1 %372, %v63_v15  }
  0x1e   :  { %85 = vperm.xlu0 %371, %v62_v16   ;;  %80 = vperm.xlu1 %372, %v61_v17   ;;  %v50_v16 = vld [vmem:[%s627_s2 + $0x28] sm:$0xff] }
  0x7d   :  { %v156_v19 = vpop.permute.xlu0 %155  ;;  %v146_v22 = vpop.permute.xlu1 %145 }
  0x7e   :  { %v179_v21 = vmul.f32 %v487_v18, %v156_v19  ;;  %v177_v25 = vmul.f32 %v487_v18, %v146_v22  ;;  %v35_v19 = vld [vmem:[%s626_s1 + $0x30] sm:$0xff] }
  0x80   :  { %v195_v24 = vmul.f32 %v179_v21, %v60_v20  ;;  %v193_v32 = vmul.f32 %v177_v25, %v58_v26  ;;  %v34_v25 = vld [vmem:[%s626_s1 + $0x28] sm:$0xff] }
  0x81   :  { %v151_v27 = vpop.permute.xlu0 %150  ;;  %v141_v34 = vpop.permute.xlu1 %140 }
  0x82   :  { %v178_v29 = vmul.f32 %v487_v18, %v151_v27  ;;  %v211_v30 = vadd.f32 %v195_v24, %v44_v23  ;;  %v176_v36 = vmul.f32 %v487_v18, %v141_v34  ;;  %v209_v40 = vadd.f32 %v193_v32, %v42_v35  ;;  %v49_v23 = vld [vmem:[%s627_s2 + $0x20] sm:$0xff]  ;;  %v47_v35 = vld [vmem:[%s627_s2 + $0x10] sm:$0xff] }
  0x84   :  { %v194_v33 = vmul.f32 %v178_v29, %v59_v28  ;;  %333 = vmatpush3.xpose.msra.mxu0 %v211_v30  ;;  %v192_v41 = vmul.f32 %v176_v36, %v57_v38  ;;  %v48_v29 = vld [vmem:[%s627_s2 + $0x18] sm:$0xff] }
  0x85   :  { %334 = vmatprep.subr.mxu0 %v396_v5  ;;  %v136_v39 = vpop.permute.xlu0 %135  ;;  %v131_v44 = vpop.permute.xlu1 %130 }
  0x86   :  { %v210_v37 = vadd.f32 %v194_v33, %v43_v31  ;;  %v175_v42 = vmul.f32 %v487_v18, %v136_v39  ;;  %v174_v47 = vmul.f32 %v487_v18, %v131_v44  ;;  %v208_v48 = vadd.f32 %v192_v41, %v41_v45  ;;  %v33_v31 = vld [vmem:[%s626_s1 + $0x20] sm:$0xff]  ;;  %v46_v41 = vld [vmem:[%s627_s2 + $0x8] sm:$0xff] }
  0x88   :  { %335 = vmatpush3.xpose.msra.mxu0 %v210_v37  ;;  %v191_v46 = vmul.f32 %v175_v42, %v56_v43  ;;  %v190_v52 = vmul.f32 %v174_v47, %v55_v49  ;;  %v32_v37 = vld [vmem:[%s626_s1 + $0x18] sm:$0xff]  ;;  %v31_v43 = vld [vmem:[%s626_s1 + $0x10] sm:$0xff]  ;;  %v45_v47 = vld [vmem:[%s627_s2] sm:$0xff] }
  0x89   :  { %336 = vmatprep.subr.mxu0 %v396_v5  ;;  %v126_v50 = vpop.permute.xlu0 %125  ;;  %v121_v56 = vpop.permute.xlu1 %120 }
  0x8a   :  { %v173_v53 = vmul.f32 %v487_v18, %v126_v50  ;;  %v207_v54 = vadd.f32 %v191_v46, %v40_v51  ;;  %v172_v59 = vmul.f32 %v487_v18, %v121_v56  ;;  %v206_v60 = vadd.f32 %v190_v52, %v39_v57  ;;  %v29_v51 = vld [vmem:[%s626_s1] sm:$0xff] }
  0x8b   :  { %v213_v52 = vld [vmem:[%s625_s0] sm:$0xff] }
  0x8c   :  { %337 = vmatpush3.xpose.msra.mxu0 %v209_v40  ;;  %v189_v58 = vmul.f32 %v173_v53, %v54_v55  ;;  %v188_v0 = vmul.f32 %v172_v59, %v53_v61  ;;  %v314_v53 = vld [vmem:[%s630_s5] ss:$0 sm:$0xff] }
  0x8d   :  { %338 = vmatprep.subr.mxu0 %v396_v5  ;;  %v116_v62 = vpop.permute.xlu0 %115  ;;  %v111_v4 = vpop.permute.xlu1 %110 }
  0x8e   :  { %v171_v1 = vmul.f32 %v487_v18, %v116_v62  ;;  %v205_v2 = vadd.f32 %v189_v58, %v38_v63  ;;  %v170_v8 = vmul.f32 %v487_v18, %v111_v4  ;;  %v204_v9 = vadd.f32 %v188_v0, %v37_v6 }
  0x90   :  { %339 = vmatpush3.xpose.msra.mxu0 %v208_v48  ;;  %v187_v7 = vmul.f32 %v171_v1, %v52_v3  ;;  %v186_v13 = vmul.f32 %v170_v8, %v51_v10  ;;  %v30_v48 = vld [vmem:[%s626_s1 + $0x8] sm:$0xff]  ;;  %s373_s1 = scalar_lea.vmem %s306_s21, 128 }
  0x91   :  { %340 = vmatprep.subr.mxu0 %v396_v5  ;;  %v106_v11 = vpop.permute.xlu0 %105  ;;  %v101_v17 = vpop.permute.xlu1 %100  ;;  %p374_p0 = scmp.ne.s32.totalorder %s306_s21, %s373_s1  ;;  %p379_p2 = scmp.lt.s32.totalorder %s373_s1, %s373_s1 }
  0x92   :  { %v169_v14 = vmul.f32 %v487_v18, %v106_v11  ;;  %v203_v15 = vadd.f32 %v187_v7, %v36_v12  ;;  %v168_v21 = vmul.f32 %v487_v18, %v101_v17  ;;  %v202_v22 = vadd.f32 %v186_v13, %v35_v19 }
  0x93   :  { %p380_p3 = por %p379_p2, %p378_p1 }
  0x94   :  { %341 = vmatpush3.xpose.msra.mxu0 %v207_v54  ;;  %v185_v20 = vmul.f32 %v169_v14, %v50_v16  ;;  %v184_v26 = vmul.f32 %v168_v21, %v49_v23 }
  0x95   :  { %342 = vmatprep.subr.mxu0 %v396_v5  ;;  %v96_v24 = vpop.permute.xlu0 %95  ;;  %v91_v30 = vpop.permute.xlu1 %90  ;;  %p381_p4 = pnand %p380_p3, %p374_p0 }
  0x96   :  { %v167_v27 = vmul.f32 %v487_v18, %v96_v24  ;;  %v201_v28 = vadd.f32 %v185_v20, %v34_v25  ;;  %v166_v33 = vmul.f32 %v487_v18, %v91_v30  ;;  %v200_v34 = vadd.f32 %v184_v26, %v33_v31 }
  0x98   :  { %343 = vmatpush3.xpose.msra.mxu0 %v206_v60  ;;  %v183_v32 = vmul.f32 %v167_v27, %v48_v29  ;;  %v182_v38 = vmul.f32 %v166_v33, %v47_v35 }
  0x99   :  { %344 = vmatprep.subr.mxu0 %v396_v5  ;;  %v86_v36 = vpop.permute.xlu0 %85  ;;  %v81_v42 = vpop.permute.xlu1 %80 }
  0x9a   :  { %v165_v39 = vmul.f32 %v487_v18, %v86_v36  ;;  %v199_v40 = vadd.f32 %v183_v32, %v32_v37  ;;  %v164_v45 = vmul.f32 %v487_v18, %v81_v42  ;;  %v198_v46 = vadd.f32 %v182_v38, %v31_v43 }
  0x9c   :  { %345 = vmatpush3.xpose.msra.mxu0 %v205_v2  ;;  %v181_v44 = vmul.f32 %v165_v39, %v46_v41  ;;  %v180_v49 = vmul.f32 %v164_v45, %v45_v47 }
  0x9d   :  { %346 = vmatprep.subr.mxu0 %v396_v5 }
  0x9e   :  { %v197_v50 = vadd.f32 %v181_v44, %v30_v48  ;;  %v196_v18 = vadd.f32 %v180_v49, %v29_v51 }
  0xa0   :  { %347 = vmatpush3.xpose.msra.mxu0 %v204_v9 }
  0xa1   :  { %348 = vmatprep.subr.mxu0 %v396_v5 }
  0xa4   :  { %349 = vmatpush3.xpose.msra.mxu0 %v203_v15 }
  0xa5   :  { %350 = vmatprep.subr.mxu0 %v396_v5 }
  0xa8   :  { %351 = vmatpush3.xpose.msra.mxu0 %v202_v22 }
  0xa9   :  { %352 = vmatprep.subr.mxu0 %v396_v5 }
  0xac   :  { %353 = vmatpush3.xpose.msra.mxu0 %v201_v28 }
  0xad   :  { %354 = vmatprep.subr.mxu0 %v396_v5 }
  0xb0   :  { %355 = vmatpush3.xpose.msra.mxu0 %v200_v34 }
  0xb1   :  { %356 = vmatprep.subr.mxu0 %v396_v5 }
  0xb4   :  { %357 = vmatpush3.xpose.msra.mxu0 %v199_v40 }
  0xb5   :  { %358 = vmatprep.subr.mxu0 %v396_v5 }
  0xb8   :  { %359 = vmatpush3.xpose.msra.mxu0 %v198_v46 }
  0xb9   :  { %360 = vmatprep.subr.mxu0 %v396_v5 }
  0xbc   :  { %361 = vmatpush3.xpose.msra.mxu0 %v197_v50 }
  0xbd   :  { %362 = vmatprep.subr.mxu0 %v396_v5 }
  0xc0   :  { %363 = vmatpush3.xpose.msra.mxu0 %v196_v18 }
  0xc3   :  { %365 = vmatmul.mubr.f32.vlgmr.msra.gmra.mxu0 %v213_v52 }
 0x183   :  { %v280_v54 = vpop.f32.mrf.mxu0 }
 0x184   :  { %v297_v55 = vadd.f32 %v314_v53, %v280_v54 }
 0x185   :  { %v366_v56 = vpop.f32.mrf.mxu0 }
 0x186   :  { %298 = vst [vmem:[#allocation3] sm:$0xff] %v297_v55 }
 0x187   :  { %384 = shalt.err (!%p381_p4)
}
 0x188   :  { %308 = dma.vmem_to_hbm [thread:$0]  %s306_s21, 128, %s631_s6, [#allocation4]  }
 0x189   :  { %393 = dma.done.wait [#allocation4], 128  }
 0x18a   :  { %394 = vsyncadd [#allocation4], 4294967168 }
 0x18b   :  { %312 = vsyncpa [#allocation4], 1 }

</bundles_post_ra>
